<compile_context>
chip_gen: v5e
topology: v5e:2x2
jax: 0.10.0
libtpu: 0.0.40
codegen_flags: <defaults>
</compile_context>

<pallas_src>
import jax
import jax.numpy as jnp
from functools import partial
from jax.experimental import pallas as pl
from jax.experimental.pallas import tpu as pltpu


def _mlp_softmax_kernel(xT_ref, w1T_ref, b1_ref, w2T_ref, b2_ref, outT_ref):
    # xT_ref : (D_in, TB)   batch on lanes
    # w1T_ref: (H, D_in)
    # b1_ref : (H, 1)
    # w2T_ref: (D_out, H)
    # b2_ref : (D_out, 1)
    # outT_ref: (D_out, TB)
    xT = xT_ref[...]
    w1T = w1T_ref[...]
    d_in = xT.shape[0]

    # ---- Hidden layer on the VPU: K=D_in broadcast FMAs (no MXU for K=2). ----
    # (H,1) * (1,TB) broadcasts to (H,TB).
    hidden = w1T[:, 0:1] * xT[0:1, :]
    for k in range(1, d_in):
        hidden = hidden + w1T[:, k : k + 1] * xT[k : k + 1, :]
    hidden = jnp.maximum(hidden + b1_ref[...], 0.0)            # ReLU, (H, TB)

    # ---- Output layer on the MXU (K=H=32, lane-dense N=TB result). ----
    logits = (
        jnp.dot(w2T_ref[...], hidden, preferred_element_type=jnp.float32)
        + b2_ref[...]
    )                                                           # (D_out, TB)

    # ---- Numerically-stable softmax over the class (sublane) axis. ----
    m = jnp.max(logits, axis=0, keepdims=True)                  # (1, TB)
    e = jnp.exp(logits - m)
    s = jnp.sum(e, axis=0, keepdims=True)                       # (1, TB)
    # Exact normalization: one (1, TB) reciprocal is cheap, and it guarantees
    # rows sum to 1 to float rounding (approx reciprocal broke that).
    outT_ref[...] = (e * (1.0 / s)).astype(outT_ref.dtype)


def _forward_impl(x, w1, b1, w2, b2, tb):
    B, D_in = x.shape
    H = w1.shape[1]
    D_out = w2.shape[1]

    # Batch lives on the 128-lane axis -> TB must be a multiple of 128.
    # Cap at 1024: the live f32 (H, TB) hidden activation costs TB/32 vregs,
    # so TB=1024 is the largest tile that avoids spilling the register file.
    tb = max(128, min(1024, (tb // 128) * 128))
    n_blocks = pl.cdiv(B, tb)

    # Lane-dense transposed layout.  No explicit padding: Pallas masks the
    # ragged last block's writeback; its padded lanes are never read.
    xT = x.T                                                    # (D_in, B)
    w1T = w1.T                                                  # (H, D_in)
    b1c = b1.reshape(H, 1)
    w2T = w2.T                                                  # (D_out, H)
    b2c = b2.reshape(D_out, 1)

    outT = pl.pallas_call(
        _mlp_softmax_kernel,
        out_shape=jax.ShapeDtypeStruct((D_out, B), jnp.float32),
        grid=(n_blocks,),
        in_specs=[
            pl.BlockSpec((D_in, tb), lambda i: (0, i)),   # X^T tile (pipelined)
            pl.BlockSpec((H, D_in), lambda i: (0, 0)),    # weights: VMEM-resident
            pl.BlockSpec((H, 1), lambda i: (0, 0)),
            pl.BlockSpec((D_out, H), lambda i: (0, 0)),
            pl.BlockSpec((D_out, 1), lambda i: (0, 0)),
        ],
        out_specs=pl.BlockSpec((D_out, tb), lambda i: (0, i)),
        compiler_params=pltpu.CompilerParams(
            dimension_semantics=("parallel",),            # megacore-shardable
        ),
    )(xT, w1T, b1c, w2T, b2c)

    return outT.T                                               # (B, D_out)


# jit the whole wrapper so the transposes / reshapes fuse with the pallas_call
# instead of being separate host-dispatched XLA ops.
points_classification_forward = partial(
    jax.jit(_forward_impl, static_argnums=(5,))
)


if __name__ == "__main__":
    # Small shapes implied by the module: 2-D points -> hidden=32 -> 4 classes.
    # B deliberately not a multiple of the tile to exercise the ragged tail.
    B, D_in, H, D_out = 1000, 2, 32, 4
    TB = 512

    key = jax.random.PRNGKey(0)
    kx, kw1, kb1, kw2, kb2 = jax.random.split(key, 5)

    x = jax.random.normal(kx, (B, D_in), dtype=jnp.float32)

    # Deterministic synthetic parameters (nn.Linear-style uniform init bounds).
    bound1 = 1.0 / (D_in ** 0.5)
    w1 = jax.random.uniform(kw1, (D_in, H), jnp.float32, -bound1, bound1)
    b1 = jax.random.uniform(kb1, (H,), jnp.float32, -bound1, bound1)

    bound2 = 1.0 / (H ** 0.5)
    w2 = jax.random.uniform(kw2, (H, D_out), jnp.float32, -bound2, bound2)
    b2 = jax.random.uniform(kb2, (D_out,), jnp.float32, -bound2, bound2)

    out = points_classification_forward(x, w1, b1, w2, b2, TB)
    out = jax.block_until_ready(out)

    # Reference check in plain JAX.
    h_ref = jnp.maximum(x @ w1 + b1[None, :], 0.0)
    ref = jax.nn.softmax(h_ref @ w2 + b2[None, :], axis=-1)
    assert out.shape == (B, D_out), f"bad output shape {out.shape}"
    assert jnp.allclose(out, ref, atol=2e-3, rtol=2e-3), "mismatch vs reference"
    assert jnp.allclose(jnp.sum(out, axis=-1), 1.0, atol=1e-4), "softmax rows must sum to ~1"

    print("KERNEL_OK")
</pallas_src>

<mosaic_0001>
module attributes {stable_mosaic.version = 11 : i64} {
  func.func @_mlp_softmax_kernel(%arg0: i32, %arg1: memref<2x512xf32, #tpu.memory_space<vmem>>, %arg2: memref<32x2xf32, #tpu.memory_space<vmem>>, %arg3: memref<32x1xf32, #tpu.memory_space<vmem>>, %arg4: memref<4x32xf32, #tpu.memory_space<vmem>>, %arg5: memref<4x1xf32, #tpu.memory_space<vmem>>, %arg6: memref<4x512xf32, #tpu.memory_space<vmem>>) attributes {dimension_semantics = [#tpu.dimension_semantics<parallel>], iteration_bounds = array<i64: 2>, scalar_prefetch = 0 : i64, scratch_operands = 0 : i64, tpu.core_type = #tpu.core_type<tc>, window_params = [{transform_indices = @transform_0, window_bounds = array<i64: 2, 512>}, {pipeline_mode = #tpu.pipeline_mode<synchronous>, transform_indices = @transform_1, window_bounds = array<i64: 32, 2>}, {pipeline_mode = #tpu.pipeline_mode<synchronous>, transform_indices = @transform_2, window_bounds = array<i64: 32, 1>}, {pipeline_mode = #tpu.pipeline_mode<synchronous>, transform_indices = @transform_3, window_bounds = array<i64: 4, 32>}, {pipeline_mode = #tpu.pipeline_mode<synchronous>, transform_indices = @transform_4, window_bounds = array<i64: 4, 1>}, {transform_indices = @transform_5, window_bounds = array<i64: 4, 512>}]} {
    %c0 = arith.constant 0 : index
    %c0_0 = arith.constant 0 : index
    %0 = vector.load %arg1[%c0, %c0_0] : memref<2x512xf32, #tpu.memory_space<vmem>>, vector<2x512xf32>
    %c0_1 = arith.constant 0 : index
    %c0_2 = arith.constant 0 : index
    %1 = vector.load %arg2[%c0_1, %c0_2] : memref<32x2xf32, #tpu.memory_space<vmem>>, vector<32x2xf32>
    %2 = vector.extract_strided_slice %1 {offsets = [0, 0], sizes = [32, 1], strides = [1, 1]} : vector<32x2xf32> to vector<32x1xf32>
    %3 = vector.extract_strided_slice %0 {offsets = [0, 0], sizes = [1, 512], strides = [1, 1]} : vector<2x512xf32> to vector<1x512xf32>
    %4 = vector.broadcast %2 : vector<32x1xf32> to vector<32x512xf32>
    %5 = vector.broadcast %3 : vector<1x512xf32> to vector<32x512xf32>
    %6 = arith.mulf %4, %5 : vector<32x512xf32>
    %7 = vector.extract_strided_slice %1 {offsets = [0, 1], sizes = [32, 1], strides = [1, 1]} : vector<32x2xf32> to vector<32x1xf32>
    %8 = vector.extract_strided_slice %0 {offsets = [1, 0], sizes = [1, 512], strides = [1, 1]} : vector<2x512xf32> to vector<1x512xf32>
    %9 = vector.broadcast %7 : vector<32x1xf32> to vector<32x512xf32>
    %10 = vector.broadcast %8 : vector<1x512xf32> to vector<32x512xf32>
    %11 = arith.mulf %9, %10 : vector<32x512xf32>
    %12 = arith.addf %6, %11 : vector<32x512xf32>
    %c0_3 = arith.constant 0 : index
    %c0_4 = arith.constant 0 : index
    %13 = vector.load %arg3[%c0_3, %c0_4] : memref<32x1xf32, #tpu.memory_space<vmem>>, vector<32x1xf32>
    %14 = vector.broadcast %13 : vector<32x1xf32> to vector<32x512xf32>
    %15 = arith.addf %12, %14 : vector<32x512xf32>
    %cst = arith.constant 0.000000e+00 : f32
    %16 = vector.broadcast %cst : f32 to vector<32x512xf32>
    %17 = arith.maximumf %15, %16 : vector<32x512xf32>
    %c0_5 = arith.constant 0 : index
    %c0_6 = arith.constant 0 : index
    %18 = vector.load %arg4[%c0_5, %c0_6] : memref<4x32xf32, #tpu.memory_space<vmem>>, vector<4x32xf32>
    %cst_7 = arith.constant dense<0.000000e+00> : vector<4x512xf32>
    %19 = tpu.matmul %18, %17, %cst_7 {dimension_numbers = #tpu.dot_dimension_numbers<[1], [0], [0], [1], [0, 0, 1, 1], [], []>} : vector<4x32xf32>, vector<32x512xf32>, vector<4x512xf32> -> vector<4x512xf32>
    %c0_8 = arith.constant 0 : index
    %c0_9 = arith.constant 0 : index
    %20 = vector.load %arg5[%c0_8, %c0_9] : memref<4x1xf32, #tpu.memory_space<vmem>>, vector<4x1xf32>
    %21 = vector.broadcast %20 : vector<4x1xf32> to vector<4x512xf32>
    %22 = arith.addf %19, %21 : vector<4x512xf32>
    %cst_10 = arith.constant dense<0xFF800000> : vector<512xf32>
    %23 = vector.multi_reduction <maximumf>, %22, %cst_10 [0] : vector<4x512xf32> to vector<512xf32>
    %24 = vector.shape_cast %23 : vector<512xf32> to vector<1x512xf32>
    %25 = vector.broadcast %24 : vector<1x512xf32> to vector<4x512xf32>
    %26 = arith.subf %22, %25 : vector<4x512xf32>
    %27 = math.exp %26 : vector<4x512xf32>
    %cst_11 = arith.constant dense<0.000000e+00> : vector<512xf32>
    %28 = vector.multi_reduction <add>, %27, %cst_11 [0] : vector<4x512xf32> to vector<512xf32>
    %29 = vector.shape_cast %28 : vector<512xf32> to vector<1x512xf32>
    %cst_12 = arith.constant 1.000000e+00 : f32
    %30 = vector.broadcast %cst_12 : f32 to vector<1x512xf32>
    %31 = arith.divf %30, %29 : vector<1x512xf32>
    %32 = vector.broadcast %31 : vector<1x512xf32> to vector<4x512xf32>
    %33 = arith.mulf %27, %32 : vector<4x512xf32>
    %c0_13 = arith.constant 0 : index
    %c0_14 = arith.constant 0 : index
    %34 = vector.load %arg6[%c0_13, %c0_14] : memref<4x512xf32, #tpu.memory_space<vmem>>, vector<4x512xf32>
    tpu.vector_store %arg6[%c0_13, %c0_14], %33 {strides = array<i32>} : memref<4x512xf32, #tpu.memory_space<vmem>>, vector<4x512xf32>,
    return
  }
  func.func @transform_0(%arg0: i32) -> (i32, i32) {
    %c0_i32 = arith.constant 0 : i32
    %c0_i32_0 = arith.constant 0 : i32
    return %c0_i32, %arg0 : i32, i32
  }
  func.func @transform_1(%arg0: i32) -> (i32, i32) {
    %c0_i32 = arith.constant 0 : i32
    %c0_i32_0 = arith.constant 0 : i32
    %c0_i32_1 = arith.constant 0 : i32
    return %c0_i32, %c0_i32_0 : i32, i32
  }
  func.func @transform_2(%arg0: i32) -> (i32, i32) {
    %c0_i32 = arith.constant 0 : i32
    %c0_i32_0 = arith.constant 0 : i32
    %c0_i32_1 = arith.constant 0 : i32
    return %c0_i32, %c0_i32_0 : i32, i32
  }
  func.func @transform_3(%arg0: i32) -> (i32, i32) {
    %c0_i32 = arith.constant 0 : i32
    %c0_i32_0 = arith.constant 0 : i32
    %c0_i32_1 = arith.constant 0 : i32
    return %c0_i32, %c0_i32_0 : i32, i32
  }
  func.func @transform_4(%arg0: i32) -> (i32, i32) {
    %c0_i32 = arith.constant 0 : i32
    %c0_i32_0 = arith.constant 0 : i32
    %c0_i32_1 = arith.constant 0 : i32
    return %c0_i32, %c0_i32_0 : i32, i32
  }
  func.func @transform_5(%arg0: i32) -> (i32, i32) {
    %c0_i32 = arith.constant 0 : i32
    %c0_i32_0 = arith.constant 0 : i32
    return %c0_i32, %arg0 : i32, i32
  }
}

</mosaic_0001>

<bundles_post_ra>
// kernel: _forward_impl.1
= control target key start
LH: loop header
LB: loop body
LE: loop exit
PB: predicated region body
PF: predicated region fallthrough
CT: control target
= control target key end

     0   :  { %10 = vsyncpa [#allocation3], 0  ;;  %s1044_s0 = inlined_call_operand.vmem [shape: f32[2,1000], index: 0, kind: input, shape index: {}]   ;;  %s1045_s1 = inlined_call_operand.vmem [shape: f32[32,2], index: 1, kind: input, shape index: {}]   ;;  %s1046_s2 = inlined_call_operand.vmem [shape: f32[32,1], index: 2, kind: input, shape index: {}]   ;;  %s1047_s3 = inlined_call_operand.vmem [shape: f32[4,32], index: 3, kind: input, shape index: {}]   ;;  %s1048_s4 = inlined_call_operand.vmem [shape: f32[4,1], index: 4, kind: input, shape index: {}]   ;;  %s1049_s5 = inlined_call_operand.hbm [shape: f32[4,1000], index: 5, kind: output, shape index: {}]  }
   0x1   :  { %12 = vsyncpa [#allocation3 + $0x1], 0  ;;  %s887_s18 = smov 0   ;;  %s889_s19 = smov 0  }
   0x2   :  { %s891_s20 = smov 0   ;;  %s893_s21 = smov 0  }
   0x3 LB: > { %s908_s22 = sadd.s32 4294967295, %s853_s21   ;;  %s708_s23 = sadd.s32 4294967294, %s853_s21   ;;  %s853_s21 = sphi %s893_s21, %s1055_s21   ;;  %s849_s20 = sphi %s891_s20, %s1054_s20   ;;  %s845_s19 = sphi %s889_s19, %s1053_s19   ;;  %s841_s18 = sphi %s887_s18, %s1052_s18  }
   0x4   : > { %s912_s24 = sadd.s32 1, %s853_s21   ;;  %s135_s25 = sadd.s32 1, %s849_s20 }
   0x5   : > { %s132_s26 = ssub.s32 %s853_s21, %s912_s24  ;;  %p145_p0 = scmp.ne.s32.totalorder %s849_s20, %s845_s19 }
   0x6   : > { %p133_p1 = scmp.eq.s32.totalorder %s132_s26, 0  ;;  %p146_p2 = scmp.eq.s32.totalorder %s908_s22, 1 }
   0x7   : > { %p151_p3 = scmp.ne.s32.totalorder %s845_s19, %s841_s18  ;;  %p152_p4 = scmp.eq.s32.totalorder %s708_s23, 1 }
   0x8   : > { %s923_s27 = scalar_select %p133_p1, %s849_s20, %s135_s25  }
   0x9   : > { %p925_p5 = por %p146_p2, %p145_p0  ;;  %p929_p6 = por %p152_p4, %p151_p3 }
   0xa   : > { %p711_p7 = scmp.ge.s32.totalorder %s853_s21, 1  ;;  %p191_p8 = scmp.lt.s32.totalorder %s853_s21, 3 }
   0xc   : > { %p192_p9 = pnand %p711_p7, %p191_p8 }
   0xd   : > { %s713_s7 = sshll.u32 (!%p192_p9), %s908_s22, 2  ;;  %s216_s14 = sand.u32 (!%p192_p9), 1, %s845_s19  }
   0xe   : > { %195 = sbr.rel (%p192_p9) target bundleno = 370 (0x172), region = 40  ;;  %p220_p10 = scmp.lt.s32.totalorder (!%p192_p9), %s713_s7, 7 }
   0xf   : > { %s712_s15 = sshll.u32 (!%p192_p9), %s216_s14, 4  ;;  %s724_s16 = sshll.u32 (!%p192_p9), %s908_s22, 4 }
  0x10   : > { %s218_s17 = scalar_lea.vmem (!%p192_p9), [#allocation2], %s712_s15  ;;  %s644_s26 = scalar_lea.hbm (!%p192_p9), %s1049_s5, %s724_s16 }
  0x11   : > { %s646_s22 = sshll.u32 (!%p192_p9), %s218_s17, 4  ;;  %s648_s30 = sshll.u32 (!%p192_p9), %s644_s26, 4  ;;  %s647_s22 = int_to_ptr.vmem [resolvable:$true] %s646_s22  ;;  %s649_s30 = int_to_ptr.hbm [resolvable:$true] %s648_s30 }
  0x12   : > { %s633_s6 = scalar_lea.sflag (!%p192_p9), [#allocation3], %s216_s14 }
  0x13   : > { %v230_v0 = vld [vmem:[%s1045_s1 + $0x18] sm:$0xff]  ;;  %v229_v1 = vld [vmem:[%s1045_s1 + $0x10] sm:$0xff]  ;;  %v855_v2 = vmov 0   ;;  %v228_v3 = vld [vmem:[%s1045_s1 + $0x8] sm:$0xff]  ;;  %v856_v4 = vmov 1   ;;  %s1057_s7 = smov (!%p220_p10, %s713_s7), 7 }
  0x14   : > { %768 = vset.pattern.permute.xlu1 %v855_v2  ;;  %766 = vset.pattern.permute.xlu0 %v855_v2  ;;  %v227_v5 = vld [vmem:[%s1045_s1] sm:$0xff]  ;;  %v343_v6 = vld [vmem:[%s1046_s2 + $0x18] sm:$0xff]  ;;  %v342_v7 = vld [vmem:[%s1046_s2 + $0x10] sm:$0xff]  ;;  %s714_s8 = sshll.u32 %s1057_s7, 1  ;;  %vm403_vm0 = vcmask 261120   ;;  %vm487_vm1 = vcmask 1043456  }
  0x15   : > { %248 = vperm.xlu0 %766, %v230_v0   ;;  %243 = vperm.xlu1 %768, %v229_v1   ;;  %v340_v8 = vld [vmem:[%s1046_s2] sm:$0xff]  ;;  %v341_v9 = vld [vmem:[%s1046_s2 + $0x8] sm:$0xff]  ;;  %s223_s11 = scalar_lea.vmem %s1044_s0, %s714_s8  ;;  %s805_s7 = sshra.s32 %s649_s30, 4  ;;  %s806_s7 = int_to_ptr.hbm [resolvable:$true] %s805_s7 }
  0x16   : > { %770 = vset.pattern.permute.xlu2 %v855_v2  ;;  %v397_v10 = vld [vmem:[%s1048_s4] sm:$0xf]  ;;  %s807_s8 = scalar_lea.hbm %s806_s7, 16  ;;  %p812_p0 = scmp.lt.s32.totalorder %s806_s7, %s1049_s5 }
  0x17   : > { %238 = vperm.xlu2 %770, %v228_v3   ;;  %v226_v15 = vld [vmem:[%s223_s11] sm:$0xff]  ;;  %p808_p11 = scmp.ne.s32.totalorder %s806_s7, %s807_s8  ;;  %s811_s11 = scalar_lea.hbm %s1049_s5, 32 }
  0x18   : > { %v296_v16 = vperm.slane %v226_v15, 1  ;;  %v297_v17 = vperm.slane %v226_v15, 3  ;;  %v298_v18 = vperm.slane %v226_v15, 5  ;;  %v299_v19 = vperm.slane %v226_v15, 7  ;;  %p813_p1 = scmp.lt.s32.totalorder %s811_s11, %s807_s8 }
  0x19   : > { %v252_v20 = vperm.slane %v226_v15, 0  ;;  %v253_v21 = vperm.slane %v226_v15, 2  ;;  %v254_v22 = vperm.slane %v226_v15, 4  ;;  %v255_v23 = vperm.slane %v226_v15, 6  ;;  %p809_p12 = pnand %p808_p11, %p925_p5 }
  0x1a   : > { %v304_v24 = vperm.slane %v296_v16, 1  ;;  %v305_v25 = vperm.slane %v297_v17, 1  ;;  %v306_v26 = vperm.slane %v298_v18, 1  ;;  %v307_v27 = vperm.slane %v299_v19, 1  ;;  %p814_p2 = por %p813_p1, %p812_p0 }
  0x1b   : > { %v260_v28 = vperm.slane %v252_v20, 0  ;;  %v261_v29 = vperm.slane %v253_v21, 0  ;;  %v262_v30 = vperm.slane %v254_v22, 0  ;;  %v263_v31 = vperm.slane %v255_v23, 0  ;;  %p810_p13 = pneg %p809_p12 }
  0x1d   : > { %767 = vset.pattern.permute.xlu0 %v856_v4  ;;  %769 = vset.pattern.permute.xlu1 %v856_v4  ;;  %p815_p3 = pnand %p814_p2, %p810_p13 }
  0x1e   : > { %293 = vperm.xlu0 %767, %v230_v0   ;;  %289 = vperm.xlu1 %769, %v229_v1  }
  0x1f   : > { %771 = vset.pattern.permute.xlu2 %v856_v4 }
  0x20   : > { %285 = vperm.xlu2 %771, %v228_v3  }
  0x26   : > { %772 = vset.pattern.permute.xlu1 %v855_v2  ;;  %281 = vperm.xlu0 %767, %v227_v5  }
  0x27   : > { %361 = vperm.xlu1 %772, %v343_v6  }
  0x28   : > { %773 = vset.pattern.permute.xlu2 %v855_v2 }
  0x29   : > { %233 = vperm.xlu2 %773, %v227_v5  }
  0x2e   : > { %774 = vset.pattern.permute.xlu0 %v855_v2 }
  0x2f   : > { %356 = vperm.xlu1 %772, %v342_v7   ;;  %346 = vperm.xlu0 %774, %v340_v8  }
  0x31   : > { %351 = vperm.xlu2 %773, %v341_v9  }
  0x37   : > { %400 = vperm.xlu1 %772, %v397_v10  }
  0x71   : > { %v239_v11 = vpop.permute.xlu2 %238 }
  0x72   : > { %v268_v35 = vmul.f32 %v260_v28, %v239_v11  ;;  %v269_v36 = vmul.f32 %v261_v29, %v239_v11  ;;  %v270_v37 = vmul.f32 %v262_v30, %v239_v11  ;;  %v271_v38 = vmul.f32 %v263_v31, %v239_v11 }
  0x7a   : > { %v286_v12 = vpop.permute.xlu2 %285 }
  0x7b   : > { %v312_v39 = vmul.f32 %v304_v24, %v286_v12  ;;  %v313_v40 = vmul.f32 %v305_v25, %v286_v12  ;;  %v314_v41 = vmul.f32 %v306_v26, %v286_v12  ;;  %v315_v42 = vmul.f32 %v307_v27, %v286_v12 }
  0x7d   : > { %v328_v51 = vadd.f32 %v312_v39, %v268_v35  ;;  %v329_v52 = vadd.f32 %v313_v40, %v269_v36  ;;  %v330_v53 = vadd.f32 %v314_v41, %v270_v37  ;;  %v331_v54 = vadd.f32 %v315_v42, %v271_v38 }
  0x83   : > { %v234_v34 = vpop.permute.xlu2 %233 }
  0x84   : > { %v264_v60 = vmul.f32 %v260_v28, %v234_v34  ;;  %v265_v61 = vmul.f32 %v261_v29, %v234_v34  ;;  %v266_v62 = vmul.f32 %v262_v30, %v234_v34  ;;  %v267_v63 = vmul.f32 %v263_v31, %v234_v34 }
  0x87   : > { %v966_v13 = vpop.permute.xlu1 %243  ;;  %v249_v14 = vpop.permute.xlu0 %248 }
  0x88   : > { %v276_v47 = vmul.f32 %v260_v28, %v249_v14  ;;  %v277_v48 = vmul.f32 %v261_v29, %v249_v14  ;;  %v278_v49 = vmul.f32 %v262_v30, %v249_v14  ;;  %v279_v50 = vmul.f32 %v263_v31, %v249_v14 }
  0x89   : > { %v272_v15 = vmul.f32 %v260_v28, %v966_v13  ;;  %v273_v16 = vmul.f32 %v261_v29, %v966_v13  ;;  %v274_v19 = vmul.f32 %v262_v30, %v966_v13  ;;  %v275_v20 = vmul.f32 %v263_v31, %v966_v13 }
  0x8b   : > { %v352_v5 = vpop.permute.xlu2 %351 }
  0x8c   : > { %v368_v21 = vadd.f32 %v352_v5, %v328_v51 }
  0x90   : > { %v294_v32 = vpop.permute.xlu0 %293  ;;  %v290_v33 = vpop.permute.xlu1 %289 }
  0x91   : > { %v320_v43 = vmul.f32 %v304_v24, %v294_v32  ;;  %v321_v44 = vmul.f32 %v305_v25, %v294_v32  ;;  %v322_v45 = vmul.f32 %v306_v26, %v294_v32  ;;  %v323_v46 = vmul.f32 %v307_v27, %v294_v32 }
  0x92   : > { %v316_v6 = vmul.f32 %v304_v24, %v290_v33  ;;  %v317_v7 = vmul.f32 %v305_v25, %v290_v33  ;;  %v318_v8 = vmul.f32 %v306_v26, %v290_v33  ;;  %v319_v9 = vmul.f32 %v307_v27, %v290_v33 }
  0x93   : > { %v336_v56 = vadd.f32 %v320_v43, %v276_v47  ;;  %v337_v57 = vadd.f32 %v321_v44, %v277_v48  ;;  %v338_v58 = vadd.f32 %v322_v45, %v278_v49  ;;  %v339_v59 = vadd.f32 %v323_v46, %v279_v50 }
  0x94   : > { %v369_v32 = vadd.f32 %v352_v5, %v329_v52  ;;  %v332_v33 = vadd.f32 %v316_v6, %v272_v15  ;;  %v333_v34 = vadd.f32 %v317_v7, %v273_v16  ;;  %v334_v35 = vadd.f32 %v318_v8, %v274_v19 }
  0x95   : > { %v335_v28 = vadd.f32 %v319_v9, %v275_v20  ;;  %v384_v48 = vmax.f32 %v368_v21, 0.0 }
  0x96   : > { %v385_v49 = vmax.f32 %v369_v32, 0.0 }
  0x98   : > { %v282_v55 = vpop.permute.xlu0 %281 }
  0x99   : > { %v362_v0 = vpop.permute.xlu1 %361  ;;  %v308_v17 = vmul.f32 %v304_v24, %v282_v55  ;;  %v309_v18 = vmul.f32 %v305_v25, %v282_v55  ;;  %v310_v22 = vmul.f32 %v306_v26, %v282_v55  ;;  %v311_v23 = vmul.f32 %v307_v27, %v282_v55 }
  0x9a   : > { %v376_v1 = vadd.f32 %v362_v0, %v336_v56  ;;  %v377_v2 = vadd.f32 %v362_v0, %v337_v57  ;;  %v378_v3 = vadd.f32 %v362_v0, %v338_v58  ;;  %v379_v4 = vadd.f32 %v362_v0, %v339_v59  ;;  %v396_v56 = vld [vmem:[%s1047_s3] sm:$0xf] }
  0x9b   : > { %v370_v24 = vadd.f32 %v352_v5, %v330_v53  ;;  %v371_v25 = vadd.f32 %v352_v5, %v331_v54  ;;  %v324_v37 = vadd.f32 %v308_v17, %v264_v60  ;;  %v325_v30 = vadd.f32 %v309_v18, %v265_v61 }
  0x9c   : > { %v392_v10 = vmax.f32 %v376_v1, 0.0  ;;  %v393_v11 = vmax.f32 %v377_v2, 0.0  ;;  %v394_v12 = vmax.f32 %v378_v3, 0.0  ;;  %v395_v14 = vmax.f32 %v379_v4, 0.0 }
  0x9d   : > { %v326_v27 = vadd.f32 %v310_v22, %v266_v62  ;;  %v327_v41 = vadd.f32 %v311_v23, %v267_v63  ;;  %v386_v50 = vmax.f32 %v370_v24, 0.0  ;;  %v387_v51 = vmax.f32 %v371_v25, 0.0 }
  0x9e   : > { %419 = vmatpush.msra.mxu0 %v392_v10  ;;  %439 = vmatpush.msra.mxu1 %v393_v11 }
  0x9f   : > { %459 = vmatpush.msra.mxu2 %v394_v12  ;;  %479 = vmatpush.msra.mxu3 %v395_v14 }
  0xa1   : > { %v357_v36 = vpop.permute.xlu1 %356  ;;  %v347_v29 = vpop.permute.xlu0 %346 }
  0xa2   : > { %v372_v38 = vadd.f32 %v357_v36, %v332_v33  ;;  %v373_v13 = vadd.f32 %v357_v36, %v333_v34  ;;  %v374_v31 = vadd.f32 %v357_v36, %v334_v35  ;;  %v375_v39 = vadd.f32 %v357_v36, %v335_v28 }
  0xa3   : > { %v364_v40 = vadd.f32 %v347_v29, %v324_v37  ;;  %v365_v26 = vadd.f32 %v347_v29, %v325_v30  ;;  %v366_v46 = vadd.f32 %v347_v29, %v326_v27  ;;  %v367_v47 = vadd.f32 %v347_v29, %v327_v41 }
  0xa4   : > { %v388_v42 = vmax.f32 %v372_v38, 0.0  ;;  %v389_v43 = vmax.f32 %v373_v13, 0.0  ;;  %v390_v44 = vmax.f32 %v374_v31, 0.0  ;;  %v391_v45 = vmax.f32 %v375_v39, 0.0 }
  0xa5   : > { %v380_v52 = vmax.f32 %v364_v40, 0.0  ;;  %v381_v53 = vmax.f32 %v365_v26, 0.0  ;;  %v382_v54 = vmax.f32 %v366_v46, 0.0  ;;  %v383_v55 = vmax.f32 %v367_v47, 0.0 }
  0xa6   : > { %420 = vmatpush.msra.mxu0 %v388_v42  ;;  %440 = vmatpush.msra.mxu1 %v389_v43 }
  0xa7   : > { %460 = vmatpush.msra.mxu2 %v390_v44  ;;  %480 = vmatpush.msra.mxu3 %v391_v45 }
  0xa8   : > { %421 = vmatpush.msra.mxu0 %v384_v48  ;;  %441 = vmatpush.msra.mxu1 %v385_v49 }
  0xa9   : > { %461 = vmatpush.msra.mxu2 %v386_v50  ;;  %481 = vmatpush.msra.mxu3 %v387_v51  ;;  %v401_v57 = vpop.permute.xlu1 %400 }
  0xaa   : > { %422 = vmatpush.msra.mxu0 %v380_v52  ;;  %442 = vmatpush.msra.mxu1 %v381_v53 }
  0xab   : > { %462 = vmatpush.msra.mxu2 %v382_v54  ;;  %482 = vmatpush.msra.mxu3 %v383_v55 }
  0xac   : > { %715 = vmatmul.msk.f32.vlgmr.msra.gmra.mxu0 %vm403_vm0, %v396_v56  ;;  %716 = vmatmul.msk.f32.vlgmr.msra.gmra.mxu1 %vm403_vm0, %v396_v56 }
  0xad   : > { %717 = vmatmul.msk.f32.vlgmr.msra.gmra.mxu2 %vm403_vm0, %v396_v56  ;;  %718 = vmatmul.msk.f32.vlgmr.msra.gmra.mxu3 %vm403_vm0, %v396_v56 }
 0x129   : > { %v424_v58 = vpop.f32.mrf.mxu0  ;;  %v444_v59 = vpop.f32.mrf.mxu1 }
 0x12a   : > { %v425_v60 = vadd.f32 %v424_v58, %v401_v57  ;;  %v445_v61 = vadd.f32 %v444_v59, %v401_v57 }
 0x12c   : > { %v488_v62 = vsel %vm487_vm1, %v425_v60, -inf  ;;  %v495_v63 = vsel %vm487_vm1, %v445_v61, -inf }
 0x12d   : > { %v489_v0 = vrot.slane %v488_v62, 4  ;;  %v496_v1 = vrot.slane %v495_v63, 4 }
 0x12f   : > { %v490_v2 = vmax.f32 %v488_v62, %v489_v0  ;;  %v497_v3 = vmax.f32 %v495_v63, %v496_v1 }
 0x130   : > { %v464_v4 = vpop.f32.mrf.mxu2  ;;  %v484_v5 = vpop.f32.mrf.mxu3 }
 0x131   : > { %v491_v6 = vrot.slane %v490_v2, 2  ;;  %v498_v7 = vrot.slane %v497_v3, 2  ;;  %v465_v8 = vadd.f32 %v464_v4, %v401_v57  ;;  %v485_v9 = vadd.f32 %v484_v5, %v401_v57 }
 0x133   : > { %v492_v10 = vmax.f32 %v490_v2, %v491_v6  ;;  %v499_v11 = vmax.f32 %v497_v3, %v498_v7  ;;  %v502_v12 = vsel %vm487_vm1, %v465_v8, -inf  ;;  %v509_v14 = vsel %vm487_vm1, %v485_v9, -inf }
 0x134   : > { %v503_v15 = vrot.slane %v502_v12, 4  ;;  %v510_v16 = vrot.slane %v509_v14, 4 }
 0x135   : > { %v493_v17 = vrot.slane %v492_v10, 1  ;;  %v500_v18 = vrot.slane %v499_v11, 1 }
 0x136   : > { %v504_v19 = vmax.f32 %v502_v12, %v503_v15  ;;  %v511_v20 = vmax.f32 %v509_v14, %v510_v16 }
 0x137   : > { %v494_v21 = vmax.f32 %v492_v10, %v493_v17  ;;  %v501_v22 = vmax.f32 %v499_v11, %v500_v18 }
 0x138   : > { %v505_v23 = vrot.slane %v504_v19, 2  ;;  %v512_v32 = vrot.slane %v511_v20, 2 }
 0x139   : > { %v516_v33 = vsub.f32 %v425_v60, %v494_v21  ;;  %v517_v34 = vsub.f32 %v445_v61, %v501_v22 }
 0x13a   : > { %v506_v35 = vmax.f32 %v504_v19, %v505_v23  ;;  %v513_v28 = vmax.f32 %v511_v20, %v512_v32 }
 0x13b   : > { %v520_v36 = vmul.f32 1.442695, %v516_v33  ;;  %v522_v29 = vmul.f32 1.442695, %v517_v34 }
 0x13c   : > { %v507_v24 = vrot.slane %v506_v35, 1  ;;  %v514_v25 = vrot.slane %v513_v28, 1 }
 0x13d   : > { %775 = vpow2.f32 %v520_v36 }
 0x13e   : > { %777 = vpow2.f32 %v522_v29  ;;  %v508_v37 = vmax.f32 %v506_v35, %v507_v24  ;;  %v515_v30 = vmax.f32 %v513_v28, %v514_v25 }
 0x140   : > { %v518_v38 = vsub.f32 %v465_v8, %v508_v37  ;;  %v519_v13 = vsub.f32 %v485_v9, %v515_v30 }
 0x142   : > { %v524_v31 = vmul.f32 1.442695, %v518_v38  ;;  %v526_v39 = vmul.f32 1.442695, %v519_v13 }
 0x143   : > { %v979_v40 = vpop.eup %775 }
 0x144   : > { %v981_v26 = vpop.eup %777  ;;  %v528_v27 = vsel %vm487_vm1, %v979_v40, 0.0  ;;  %779 = vpow2.f32 %v524_v31 }
 0x145   : > { %v529_v41 = vrot.slane %v528_v27, 4  ;;  %v535_v42 = vsel %vm487_vm1, %v981_v26, 0.0  ;;  %781 = vpow2.f32 %v526_v39 }
 0x146   : > { %v536_v43 = vrot.slane %v535_v42, 4 }
 0x147   : > { %v530_v44 = vadd.f32 %v529_v41, %v528_v27 }
 0x148   : > { %v537_v45 = vadd.f32 %v536_v43, %v535_v42 }
 0x149   : > { %v531_v46 = vrot.slane %v530_v44, 2 }
 0x14a   : > { %v987_v47 = vpop.eup %779  ;;  %v538_v48 = vrot.slane %v537_v45, 2 }
 0x14b   : > { %v989_v49 = vpop.eup %781  ;;  %v532_v50 = vadd.f32 %v531_v46, %v530_v44  ;;  %v542_v51 = vsel %vm487_vm1, %v987_v47, 0.0 }
 0x14c   : > { %v539_v52 = vadd.f32 %v538_v48, %v537_v45  ;;  %v543_v53 = vrot.slane %v542_v51, 4  ;;  %v549_v54 = vsel %vm487_vm1, %v989_v49, 0.0 }
 0x14d   : > { %v533_v55 = vrot.slane %v532_v50, 1  ;;  %v550_v56 = vrot.slane %v549_v54, 4 }
 0x14e   : > { %v540_v57 = vrot.slane %v539_v52, 1  ;;  %v544_v58 = vadd.f32 %v543_v53, %v542_v51 }
 0x14f   : > { %v534_v59 = vadd.f32 %v533_v55, %v532_v50  ;;  %v551_v60 = vadd.f32 %v550_v56, %v549_v54 }
 0x150   : > { %v541_v61 = vadd.f32 %v540_v57, %v539_v52  ;;  %v545_v62 = vrot.slane %v544_v58, 2 }
 0x151   : > { %783 = vrcp.f32 %v534_v59  ;;  %v552_v0 = vrot.slane %v551_v60, 2  ;;  %v567_v11 = vand.u32 2147483648, %v534_v59  ;;  %v565_v16 = vand.u32 2147483647, %v534_v59 }
 0x152   : > { %785 = vrcp.f32 %v541_v61  ;;  %v546_v63 = vadd.f32 %v545_v62, %v544_v58  ;;  %v582_v15 = vand.u32 2147483648, %v541_v61  ;;  %v580_v18 = vand.u32 2147483647, %v541_v61 }
 0x153   : > { %v553_v2 = vadd.f32 %v552_v0, %v551_v60  ;;  %vm561_vm4 = vweird.f32 %v534_v59  ;;  %vm576_vm6 = vweird.f32 %v541_v61  ;;  %v568_v23 = vor.u32 1.1754944e-38, %v567_v11 }
 0x154   : > { %v547_v1 = vrot.slane %v546_v63, 1  ;;  %v583_v32 = vor.u32 1.1754944e-38, %v582_v15  ;;  %vm566_vm8 = vcmp.eq.f32.partialorder %v565_v16, 8.507059e+37  ;;  %vm581_vm9 = vcmp.eq.f32.partialorder %v580_v18, 8.507059e+37 }
 0x155   : > { %v554_v5 = vrot.slane %v553_v2, 1 }
 0x156   : > { %v995_v4 = vadd.f32 %v547_v1, %v546_v63 }
 0x157   : > { %v784_v3 = vpop.eup %783  ;;  %v555_v10 = vadd.f32 %v554_v5, %v553_v2 }
 0x158   : > { %v786_v6 = vpop.eup %785  ;;  %v557_v7 = vmul.f32 %v784_v3, %v534_v59  ;;  %787 = vrcp.f32 %v995_v4  ;;  %vm562_vm2 = vweird.f32 %v784_v3  ;;  %vm591_vm10 = vweird.f32 %v995_v4 }
 0x159   : > { %v572_v8 = vmul.f32 %v786_v6, %v541_v61  ;;  %789 = vrcp.f32 %v555_v10  ;;  %vm577_vm3 = vweird.f32 %v786_v6  ;;  %vm563_vm5 = vmor %vm561_vm4, %vm562_vm2  ;;  %v595_v39 = vand.u32 2147483647, %v995_v4 }
 0x15a   : > { %v558_v9 = vsub.f32 1.0, %v557_v7  ;;  %vm578_vm7 = vmor %vm576_vm6, %vm577_vm3  ;;  %v597_v27 = vand.u32 2147483648, %v995_v4  ;;  %v612_v41 = vand.u32 2147483648, %v555_v10  ;;  %v610_v43 = vand.u32 2147483647, %v555_v10 }
 0x15b   : > { %v573_v12 = vsub.f32 1.0, %v572_v8  ;;  %vm606_vm14 = vweird.f32 %v555_v10  ;;  %vm596_vm0 = vcmp.eq.f32.partialorder %v595_v39, 8.507059e+37 }
 0x15c   : > { %v559_v14 = vmul.f32 %v784_v3, %v558_v9  ;;  %v598_v45 = vor.u32 1.1754944e-38, %v597_v27  ;;  %v613_v46 = vor.u32 1.1754944e-38, %v612_v41  ;;  %vm611_vm2 = vcmp.eq.f32.partialorder %v610_v43, 8.507059e+37 }
 0x15d   : > { %v574_v17 = vmul.f32 %v786_v6, %v573_v12 }
 0x15e   : > { %v560_v19 = vadd.f32 %v784_v3, %v559_v14  ;;  %v788_v20 = vpop.eup %787 }
 0x15f   : > { %v575_v21 = vadd.f32 %v786_v6, %v574_v17  ;;  %v587_v33 = vmul.f32 %v788_v20, %v995_v4  ;;  %v790_v35 = vpop.eup %789  ;;  %vm592_vm11 = vweird.f32 %v788_v20 }
 0x160   : > { %v564_v22 = vsel %vm563_vm5, %v784_v3, %v560_v19  ;;  %v602_v25 = vmul.f32 %v790_v35, %v555_v10  ;;  %vm607_vm12 = vweird.f32 %v790_v35  ;;  %vm593_vm13 = vmor %vm591_vm10, %vm592_vm11 }
 0x161   : > { %v579_v34 = vsel %vm578_vm7, %v786_v6, %v575_v21  ;;  %v569_v28 = vsel %vm566_vm8, %v568_v23, %v564_v22  ;;  %v588_v29 = vsub.f32 1.0, %v587_v33  ;;  %vm608_vm15 = vmor %vm606_vm14, %vm607_vm12 }
 0x162   : > { %v584_v36 = vsel %vm581_vm9, %v583_v32, %v579_v34  ;;  %v616_v30 = vmul.f32 %v979_v40, %v569_v28  ;;  %v603_v13 = vsub.f32 1.0, %v602_v25 }
 0x163   : > { %v617_v24 = vmul.f32 %v981_v26, %v584_v36  ;;  %v589_v37 = vmul.f32 %v788_v20, %v588_v29 }
 0x164   : > { %v604_v42 = vmul.f32 %v790_v35, %v603_v13 }
 0x165   : > { %v624_v38 = vrot.slane %v617_v24, 4  ;;  %v590_v31 = vadd.f32 %v788_v20, %v589_v37 }
 0x166   : > { %v605_v40 = vadd.f32 %v790_v35, %v604_v42 }
 0x167   : > { %v626_v26 = vsel %vm487_vm1, %v616_v30, %v624_v38  ;;  %v594_v44 = vsel %vm593_vm13, %v788_v20, %v590_v31 }
 0x168   : > { %630 = vst [vmem:[%s218_s17] sm:$0xff] %v626_v26  ;;  %v609_v48 = vsel %vm608_vm15, %v790_v35, %v605_v40  ;;  %v599_v50 = vsel %vm596_vm0, %v598_v45, %v594_v44 }
 0x169   : > { %v614_v51 = vsel %vm611_vm2, %v613_v46, %v609_v48  ;;  %v618_v53 = vmul.f32 %v987_v47, %v599_v50 }
 0x16a   : > { %v619_v52 = vmul.f32 %v989_v49, %v614_v51 }
 0x16c   : > { %v625_v54 = vrot.slane %v619_v52, 4 }
 0x16e   : > { %v627_v55 = vsel %vm487_vm1, %v618_v53, %v625_v54 }
 0x16f   : > { %631 = vst [vmem:[%s218_s17 + $0x8] sm:$0xff] %v627_v55 }
 0x170   : > { %818 = shalt.err (!%p815_p3)
}
 0x171   : > { %725 = dma.vmem_to_hbm [thread:$0]  (%p925_p5), %s647_s22, 256, %s649_s30, %s633_s6  }
 0x172 PF: > { %p731_p4 = scmp.ge.s32.totalorder %s853_s21, 2  ;;  %s660_s14 = sand.u32 1, %s841_s18  }
 0x173   : > { %s661_s15 = scalar_lea.sflag [#allocation3], %s660_s14 }
 0x174   : > { %p728_p7 = pnand %p731_p4, %p929_p6 }
 0x176   : > { %p729_p8 = pneg %p728_p7 }
 0x178   : > { %836 = dma.done.wait (%p729_p8), %s661_s15, 256  }
 0x179   : > { %838 = vsyncadd (%p729_p8), %s661_s15, 4294967040  ;;  %p15_p9 = scmp.ge.s32.totalorder %s912_s24, 4   ;;  %s1052_s18 = smov %s845_s19 }
 0x17a   : > { %s1053_s19 = smov %s849_s20  ;;  %s1054_s20 = smov %s923_s27 }
 0x17b   : > { %s1055_s21 = smov %s912_s24  ;;  %17 = sbr.rel (!%p15_p9) target bundleno = 3 (0x3), region = 75 }
 0x180   :  { %667 = vsyncpa [#allocation3], 1 }
 0x181   :  { %669 = vsyncpa [#allocation3 + $0x1], 1 }

</bundles_post_ra>
